<compile_context>
chip_gen: v7x
topology: tpu7x:2x2x1
jax: 0.10.0
libtpu: 0.0.40
codegen_flags: <defaults>
</compile_context>

<pallas_src>
import jax
import jax.numpy as jnp
from jax.experimental import pallas as pl
from jax.experimental.pallas import tpu as pltpu

LANE = 128
SUBLANE = 8
MAX_TILE_ROWS = 4096        # 4096 x 128 x f32 = 2 MiB per input per buffer
SPLIT_MIN_ROWS = 2048       # 2-core split only if each core gets >= 1024 rows
PAD_LOGIT = -100.0          # softplus(-100) == 0 in f32 -> padding adds nothing


def _cdiv(a, b):
    return -(-a // b)


def _round_up(a, b):
    return _cdiv(a, b) * b


def _bbce_sums_kernel(p_ref, g_ref, gt_acc, pos_acc, neg_acc):
    """Accumulate sum(gt), sum(gt*softplus(-x)), sum((1-gt)*softplus(x))."""

    @pl.when(pl.program_id(1) == 0)
    def _init():
        gt_acc[...] = jnp.zeros_like(gt_acc)
        pos_acc[...] = jnp.zeros_like(pos_acc)
        neg_acc[...] = jnp.zeros_like(neg_acc)

    x = p_ref[...].astype(jnp.float32)      # logits
    y = g_ref[...].astype(jnp.float32)      # targets in [0, 1]

    # Numerically stable pieces:
    #   softplus(x)  = -log(1 - sigmoid(x)) = max(x, 0) + log1p(exp(-|x|))
    #   softplus(-x) = -log(sigmoid(x))     = softplus(x) - x   (exact in fp)
    sp = jnp.log1p(jnp.exp(-jnp.abs(x)))          # EUP work (free-ish slot)
    nl_one_minus_sig = jnp.maximum(x, 0.0) + sp
    nl_sig = nl_one_minus_sig - x

    r = x.shape[0] // SUBLANE

    def fold(v):                            # (tile_rows,128) -> (8,128), VPU adds
        return jnp.sum(v.reshape(r, SUBLANE, LANE), axis=0)

    gt_acc[...] += fold(y)
    pos_acc[...] += fold(y * nl_sig)
    neg_acc[...] += fold((1.0 - y) * nl_one_minus_sig)


@jax.jit
def bbce_with_logit_loss(pred, gt):
    """Balanced BCEWithLogitLoss. pred, gt: same shape (any), pred=logits."""
    eps = 1e-10
    n = pred.size

    flat_p = pred.reshape(-1)       # keep native dtype; cast happens in-kernel
    flat_g = gt.reshape(-1)

    # Balanced tiling with minimal padding.
    rows8 = _round_up(_cdiv(n, LANE), SUBLANE)
    ncores = 2 if rows8 >= SPLIT_MIN_ROWS else 1   # v7x 2-TC; no-op on v5e/v6e
    per_core_rows = _round_up(_cdiv(rows8, ncores), SUBLANE)
    steps_per_core = _cdiv(per_core_rows, MAX_TILE_ROWS)
    tile_rows = _round_up(_cdiv(per_core_rows, steps_per_core), SUBLANE)
    rows_pad = ncores * steps_per_core * tile_rows
    n_pad = rows_pad * LANE

    if n_pad != n:
        # Pad contributes exactly zero to all three accumulated sums.
        flat_p = jnp.pad(flat_p, (0, n_pad - n), constant_values=PAD_LOGIT)
        flat_g = jnp.pad(flat_g, (0, n_pad - n))

    p2 = flat_p.reshape(rows_pad, LANE)
    g2 = flat_g.reshape(rows_pad, LANE)

    in_spec = pl.BlockSpec((tile_rows, LANE),
                           lambda c, i: (c * steps_per_core + i, 0))
    acc_spec = pl.BlockSpec((None, SUBLANE, LANE), lambda c, i: (c, 0, 0))
    acc_shape = jax.ShapeDtypeStruct((ncores, SUBLANE, LANE), jnp.float32)

    gt_parts, pos_parts, neg_parts = pl.pallas_call(
        _bbce_sums_kernel,
        out_shape=(acc_shape, acc_shape, acc_shape),
        grid_spec=pltpu.PrefetchScalarGridSpec(
            num_scalar_prefetch=0,
            grid=(ncores, steps_per_core),
            in_specs=[in_spec, in_spec],
            out_specs=(acc_spec, acc_spec, acc_spec),
        ),
        compiler_params=pltpu.CompilerParams(
            dimension_semantics=("parallel", "arbitrary")),
    )(p2, g2)

    s_gt = jnp.sum(gt_parts)     # sum(gt)
    s_pos = jnp.sum(pos_parts)   # sum(gt * -log(sigmoid(pred)))
    s_neg = jnp.sum(neg_parts)   # sum((1-gt) * -log(1 - sigmoid(pred)))

    n_f = jnp.float32(n)
    count_pos = s_gt + eps
    count_neg = n_f - s_gt
    ratio = count_neg / count_pos
    w_neg = count_pos / (count_pos + count_neg)

    # BCEWithLogitsLoss(pos_weight=ratio), reduction='mean'
    mean_bce = (ratio * s_pos + s_neg) / n_f
    return w_neg * mean_bce


def _reference(pred, gt):
    """Pure-JAX reference mirroring the PyTorch module."""
    eps = 1e-10
    pred = pred.astype(jnp.float32)
    gt = gt.astype(jnp.float32)
    count_pos = jnp.sum(gt) + eps
    count_neg = jnp.sum(1.0 - gt)
    ratio = count_neg / count_pos
    w_neg = count_pos / (count_pos + count_neg)
    sp = jnp.log1p(jnp.exp(-jnp.abs(pred)))
    pos_term = jnp.maximum(-pred, 0.0) + sp
    neg_term = jnp.maximum(pred, 0.0) + sp
    per_elem = ratio * gt * pos_term + (1.0 - gt) * neg_term
    return w_neg * jnp.mean(per_elem)


if __name__ == "__main__":
    key = jax.random.PRNGKey(0)
    k1, k2, k3, k4, k5, k6 = jax.random.split(key, 6)

    # SAM-COD predicts single-channel saliency logits: (B, C, H, W)
    pred = jax.random.normal(k1, (2, 1, 16, 16), dtype=jnp.float32) * 2.0
    gt = (jax.random.uniform(k2, (2, 1, 16, 16)) > 0.7).astype(jnp.float32)

    loss = jax.block_until_ready(bbce_with_logit_loss(pred, gt))
    ref = jax.block_until_ready(_reference(pred, gt))
    assert jnp.allclose(loss, ref, rtol=1e-5, atol=1e-6), (loss, ref)

    # Non-lane-divisible shape exercising the zero-contribution padding path.
    pred_o = jax.random.normal(k5, (2, 1, 50, 50), dtype=jnp.float32) * 3.0
    gt_o = (jax.random.uniform(k6, (2, 1, 50, 50)) > 0.5).astype(jnp.float32)

    loss_o = jax.block_until_ready(bbce_with_logit_loss(pred_o, gt_o))
    ref_o = jax.block_until_ready(_reference(pred_o, gt_o))
    assert jnp.allclose(loss_o, ref_o, rtol=1e-5, atol=1e-6), (loss_o, ref_o)

    # Larger case exercising the multi-block path, the 2-way 'parallel'
    # core split, and native (bf16) input dtype.
    pred_b = (jax.random.normal(k3, (4, 1, 256, 256), dtype=jnp.float32)
              * 2.0).astype(jnp.bfloat16)
    gt_b = (jax.random.uniform(k4, (4, 1, 256, 256)) > 0.6).astype(jnp.float32)

    loss_b = jax.block_until_ready(bbce_with_logit_loss(pred_b, gt_b))
    ref_b = jax.block_until_ready(_reference(pred_b, gt_b))
    assert jnp.allclose(loss_b, ref_b, rtol=1e-4, atol=1e-6), (loss_b, ref_b)

    print("KERNEL_OK")
</pallas_src>

<mosaic_0001>
module attributes {stable_mosaic.version = 11 : i64} {
  func.func @_bbce_sums_kernel(%arg0: i32, %arg1: i32, %arg2: memref<8x128xf32, #tpu.memory_space<vmem>>, %arg3: memref<8x128xf32, #tpu.memory_space<vmem>>, %arg4: memref<1x8x128xf32, #tpu.memory_space<vmem>>, %arg5: memref<1x8x128xf32, #tpu.memory_space<vmem>>, %arg6: memref<1x8x128xf32, #tpu.memory_space<vmem>>) attributes {dimension_semantics = [#tpu.dimension_semantics<parallel>, #tpu.dimension_semantics<arbitrary>], iteration_bounds = array<i64: 1, 1>, scalar_prefetch = 0 : i64, scratch_operands = 0 : i64, tpu.core_type = #tpu.core_type<tc>, window_params = [{transform_indices = @transform_0, window_bounds = array<i64: 8, 128>}, {transform_indices = @transform_1, window_bounds = array<i64: 8, 128>}, {transform_indices = @transform_2, window_bounds = array<i64: 1, 8, 128>}, {transform_indices = @transform_3, window_bounds = array<i64: 1, 8, 128>}, {transform_indices = @transform_4, window_bounds = array<i64: 1, 8, 128>}]} {
    %c0_i32 = arith.constant 0 : i32
    %0 = arith.cmpi eq, %arg1, %c0_i32 : i32
    %1 = arith.extui %0 : i1 to i32
    %c0_i32_0 = arith.constant 0 : i32
    %2 = arith.cmpi ne, %1, %c0_i32_0 : i32
    scf.if %2 {
      %cst_27 = arith.constant 0.000000e+00 : f32
      %42 = vector.broadcast %cst_27 : f32 to vector<8x128xf32>
      %c0_28 = arith.constant 0 : index
      %c0_29 = arith.constant 0 : index
      %c0_30 = arith.constant 0 : index
      %43 = vector.load %arg4[%c0_28, %c0_29, %c0_30] : memref<1x8x128xf32, #tpu.memory_space<vmem>>, vector<1x8x128xf32>
      %44 = vector.shape_cast %43 : vector<1x8x128xf32> to vector<8x128xf32>
      %45 = vector.shape_cast %42 : vector<8x128xf32> to vector<1x8x128xf32>
      tpu.vector_store %arg4[%c0_28, %c0_29, %c0_30], %45 {strides = array<i32>} : memref<1x8x128xf32, #tpu.memory_space<vmem>>, vector<1x8x128xf32>,
      %cst_31 = arith.constant 0.000000e+00 : f32
      %46 = vector.broadcast %cst_31 : f32 to vector<8x128xf32>
      %c0_32 = arith.constant 0 : index
      %c0_33 = arith.constant 0 : index
      %c0_34 = arith.constant 0 : index
      %47 = vector.load %arg5[%c0_32, %c0_33, %c0_34] : memref<1x8x128xf32, #tpu.memory_space<vmem>>, vector<1x8x128xf32>
      %48 = vector.shape_cast %47 : vector<1x8x128xf32> to vector<8x128xf32>
      %49 = vector.shape_cast %46 : vector<8x128xf32> to vector<1x8x128xf32>
      tpu.vector_store %arg5[%c0_32, %c0_33, %c0_34], %49 {strides = array<i32>} : memref<1x8x128xf32, #tpu.memory_space<vmem>>, vector<1x8x128xf32>,
      %cst_35 = arith.constant 0.000000e+00 : f32
      %50 = vector.broadcast %cst_35 : f32 to vector<8x128xf32>
      %c0_36 = arith.constant 0 : index
      %c0_37 = arith.constant 0 : index
      %c0_38 = arith.constant 0 : index
      %51 = vector.load %arg6[%c0_36, %c0_37, %c0_38] : memref<1x8x128xf32, #tpu.memory_space<vmem>>, vector<1x8x128xf32>
      %52 = vector.shape_cast %51 : vector<1x8x128xf32> to vector<8x128xf32>
      %53 = vector.shape_cast %50 : vector<8x128xf32> to vector<1x8x128xf32>
      tpu.vector_store %arg6[%c0_36, %c0_37, %c0_38], %53 {strides = array<i32>} : memref<1x8x128xf32, #tpu.memory_space<vmem>>, vector<1x8x128xf32>,
    } else {
    }
    %c0 = arith.constant 0 : index
    %c0_1 = arith.constant 0 : index
    %3 = vector.load %arg2[%c0, %c0_1] : memref<8x128xf32, #tpu.memory_space<vmem>>, vector<8x128xf32>
    %c0_2 = arith.constant 0 : index
    %c0_3 = arith.constant 0 : index
    %4 = vector.load %arg3[%c0_2, %c0_3] : memref<8x128xf32, #tpu.memory_space<vmem>>, vector<8x128xf32>
    %5 = math.absf %3 : vector<8x128xf32>
    %cst = arith.constant 0.000000e+00 : f32
    %6 = vector.broadcast %cst : f32 to vector<8x128xf32>
    %7 = arith.subf %6, %5 : vector<8x128xf32>
    %8 = math.exp %7 : vector<8x128xf32>
    %9 = math.log1p %8 : vector<8x128xf32>
    %cst_4 = arith.constant 0.000000e+00 : f32
    %10 = vector.broadcast %cst_4 : f32 to vector<8x128xf32>
    %11 = arith.maximumf %3, %10 : vector<8x128xf32>
    %12 = arith.addf %11, %9 : vector<8x128xf32>
    %13 = arith.subf %12, %3 : vector<8x128xf32>
    %c0_5 = arith.constant 0 : index
    %c0_6 = arith.constant 0 : index
    %c0_7 = arith.constant 0 : index
    %14 = vector.load %arg4[%c0_5, %c0_6, %c0_7] : memref<1x8x128xf32, #tpu.memory_space<vmem>>, vector<1x8x128xf32>
    %15 = vector.shape_cast %14 : vector<1x8x128xf32> to vector<8x128xf32>
    %16 = vector.shape_cast %4 : vector<8x128xf32> to vector<1x8x128xf32>
    %cst_8 = arith.constant dense<0.000000e+00> : vector<8x128xf32>
    %17 = vector.multi_reduction <add>, %16, %cst_8 [0] : vector<1x8x128xf32> to vector<8x128xf32>
    %18 = arith.addf %15, %17 : vector<8x128xf32>
    %c0_9 = arith.constant 0 : index
    %c0_10 = arith.constant 0 : index
    %c0_11 = arith.constant 0 : index
    %19 = vector.load %arg4[%c0_9, %c0_10, %c0_11] : memref<1x8x128xf32, #tpu.memory_space<vmem>>, vector<1x8x128xf32>
    %20 = vector.shape_cast %19 : vector<1x8x128xf32> to vector<8x128xf32>
    %21 = vector.shape_cast %18 : vector<8x128xf32> to vector<1x8x128xf32>
    tpu.vector_store %arg4[%c0_9, %c0_10, %c0_11], %21 {strides = array<i32>} : memref<1x8x128xf32, #tpu.memory_space<vmem>>, vector<1x8x128xf32>,
    %c0_12 = arith.constant 0 : index
    %c0_13 = arith.constant 0 : index
    %c0_14 = arith.constant 0 : index
    %22 = vector.load %arg5[%c0_12, %c0_13, %c0_14] : memref<1x8x128xf32, #tpu.memory_space<vmem>>, vector<1x8x128xf32>
    %23 = vector.shape_cast %22 : vector<1x8x128xf32> to vector<8x128xf32>
    %24 = arith.mulf %4, %13 : vector<8x128xf32>
    %25 = vector.shape_cast %24 : vector<8x128xf32> to vector<1x8x128xf32>
    %cst_15 = arith.constant dense<0.000000e+00> : vector<8x128xf32>
    %26 = vector.multi_reduction <add>, %25, %cst_15 [0] : vector<1x8x128xf32> to vector<8x128xf32>
    %27 = arith.addf %23, %26 : vector<8x128xf32>
    %c0_16 = arith.constant 0 : index
    %c0_17 = arith.constant 0 : index
    %c0_18 = arith.constant 0 : index
    %28 = vector.load %arg5[%c0_16, %c0_17, %c0_18] : memref<1x8x128xf32, #tpu.memory_space<vmem>>, vector<1x8x128xf32>
    %29 = vector.shape_cast %28 : vector<1x8x128xf32> to vector<8x128xf32>
    %30 = vector.shape_cast %27 : vector<8x128xf32> to vector<1x8x128xf32>
    tpu.vector_store %arg5[%c0_16, %c0_17, %c0_18], %30 {strides = array<i32>} : memref<1x8x128xf32, #tpu.memory_space<vmem>>, vector<1x8x128xf32>,
    %c0_19 = arith.constant 0 : index
    %c0_20 = arith.constant 0 : index
    %c0_21 = arith.constant 0 : index
    %31 = vector.load %arg6[%c0_19, %c0_20, %c0_21] : memref<1x8x128xf32, #tpu.memory_space<vmem>>, vector<1x8x128xf32>
    %32 = vector.shape_cast %31 : vector<1x8x128xf32> to vector<8x128xf32>
    %cst_22 = arith.constant 1.000000e+00 : f32
    %33 = vector.broadcast %cst_22 : f32 to vector<8x128xf32>
    %34 = arith.subf %33, %4 : vector<8x128xf32>
    %35 = arith.mulf %34, %12 : vector<8x128xf32>
    %36 = vector.shape_cast %35 : vector<8x128xf32> to vector<1x8x128xf32>
    %cst_23 = arith.constant dense<0.000000e+00> : vector<8x128xf32>
    %37 = vector.multi_reduction <add>, %36, %cst_23 [0] : vector<1x8x128xf32> to vector<8x128xf32>
    %38 = arith.addf %32, %37 : vector<8x128xf32>
    %c0_24 = arith.constant 0 : index
    %c0_25 = arith.constant 0 : index
    %c0_26 = arith.constant 0 : index
    %39 = vector.load %arg6[%c0_24, %c0_25, %c0_26] : memref<1x8x128xf32, #tpu.memory_space<vmem>>, vector<1x8x128xf32>
    %40 = vector.shape_cast %39 : vector<1x8x128xf32> to vector<8x128xf32>
    %41 = vector.shape_cast %38 : vector<8x128xf32> to vector<1x8x128xf32>
    tpu.vector_store %arg6[%c0_24, %c0_25, %c0_26], %41 {strides = array<i32>} : memref<1x8x128xf32, #tpu.memory_space<vmem>>, vector<1x8x128xf32>,
    return
  }
  func.func @transform_0(%arg0: i32, %arg1: i32) -> (i32, i32) {
    %c1_i32 = arith.constant 1 : i32
    %0 = arith.muli %arg0, %c1_i32 : i32
    %1 = arith.addi %0, %arg1 : i32
    %c0_i32 = arith.constant 0 : i32
    %c0_i32_0 = arith.constant 0 : i32
    return %1, %c0_i32 : i32, i32
  }
  func.func @transform_1(%arg0: i32, %arg1: i32) -> (i32, i32) {
    %c1_i32 = arith.constant 1 : i32
    %0 = arith.muli %arg0, %c1_i32 : i32
    %1 = arith.addi %0, %arg1 : i32
    %c0_i32 = arith.constant 0 : i32
    %c0_i32_0 = arith.constant 0 : i32
    return %1, %c0_i32 : i32, i32
  }
  func.func @transform_2(%arg0: i32, %arg1: i32) -> (i32, i32, i32) {
    %c0_i32 = arith.constant 0 : i32
    %c0_i32_0 = arith.constant 0 : i32
    %c0_i32_1 = arith.constant 0 : i32
    return %arg0, %c0_i32, %c0_i32_0 : i32, i32, i32
  }
  func.func @transform_3(%arg0: i32, %arg1: i32) -> (i32, i32, i32) {
    %c0_i32 = arith.constant 0 : i32
    %c0_i32_0 = arith.constant 0 : i32
    %c0_i32_1 = arith.constant 0 : i32
    return %arg0, %c0_i32, %c0_i32_0 : i32, i32, i32
  }
  func.func @transform_4(%arg0: i32, %arg1: i32) -> (i32, i32, i32) {
    %c0_i32 = arith.constant 0 : i32
    %c0_i32_0 = arith.constant 0 : i32
    %c0_i32_1 = arith.constant 0 : i32
    return %arg0, %c0_i32, %c0_i32_0 : i32, i32, i32
  }
}

</mosaic_0001>

<bundles_post_ra>
// kernel: bbce_with_logit_loss.1
= control target key start
LH: loop header
LB: loop body
LE: loop exit
PB: predicated region body
PF: predicated region fallthrough
CT: control target
= control target key end

     0   :  { %s157_s1 = inlined_call_operand.vmem [shape: f32[8,128], index: 1, kind: input, shape index: {}]   ;;  %s158_s0 = inlined_call_operand.vmem [shape: f32[8,128], index: 0, kind: input, shape index: {}]   ;;  %s159_s2 = inlined_call_operand.vmem [shape: f32[1,8,128], index: 2, kind: output, shape index: {0}]   ;;  %s160_s4 = inlined_call_operand.vmem [shape: f32[1,8,128], index: 4, kind: output, shape index: {2}]   ;;  %s161_s3 = inlined_call_operand.vmem [shape: f32[1,8,128], index: 3, kind: output, shape index: {1}]  }
   0x1   :  { %v56_v0 = vld [vmem:[%s157_s1] sm:$0xff] }
   0x2   :  { %v55_v1 = vld [vmem:[%s158_s0] sm:$0xff]  ;;  %76 = vst [vmem:[%s159_s2] sm:$0xff] %v56_v0  ;;  %v83_v14 = vsub.f32 1.0, %v56_v0 }
   0x3   :  { %v57_v2 = vand.u32 2147483647, %v55_v1  ;;  %v70_v12 = vmax.f32 %v55_v1, 0.0 }
   0x5   :  { %v58_v3 = vsub.f32 0.0, %v57_v2 }
   0x7   :  { %v59_v4 = vmul.f32 1.442695, %v58_v3 }
   0x9   :  { %113 = vpow2.f32 %v59_v4 }
  0x13   :  { %v114_v5 = vpop.eup %113 }
  0x14   :  { %v61_v6 = vadd.f32 1.0, %v114_v5  ;;  %v64_v7 = vmul.f32 -0.5, %v114_v5  ;;  %v67_v9 = vand.u32 2147483647, %v114_v5 }
  0x16   :  { %115 = vlog2.f32 %v61_v6  ;;  %v65_v8 = vadd.f32 1.0, %v64_v7  ;;  %vm68_vm0 = vcmp.lt.f32.partialorder %v67_v9, 0.0004427343 }
  0x18   :  { %v66_v10 = vmul.f32 %v114_v5, %v65_v8 }
  0x20   :  { %v116_v11 = vpop.eup %115 }
  0x21   :  { %v63_v13 = vmul.f32 0.6931472, %v116_v11 }
  0x23   :  { %v69_v15 = vsel %vm68_vm0, %v66_v10, %v63_v13 }
  0x24   :  { %v71_v16 = vadd.f32 %v70_v12, %v69_v15 }
  0x26   :  { %v72_v17 = vsub.f32 %v71_v16, %v55_v1  ;;  %v84_v18 = vmul.f32 %v83_v14, %v71_v16 }
  0x28   :  { %v78_v19 = vmul.f32 %v72_v17, %v56_v0  ;;  %87 = vst [vmem:[%s160_s4] sm:$0xff] %v84_v18 }
  0x2a   :  { %81 = vst [vmem:[%s161_s3] sm:$0xff] %v78_v19 }

</bundles_post_ra>
